<compile_context>
chip_gen: v6e
topology: v6e:2x2x1
jax: 0.10.0
libtpu: 0.0.40
codegen_flags: <defaults>
</compile_context>

<pallas_src>
import functools

import jax
import jax.numpy as jnp
import numpy as np
from jax.experimental import pallas as pl
from jax.experimental.pallas import tpu as pltpu

LANE = 128


def _round_up(x, m):
    return ((x + m - 1) // m) * m


def _vfl_forward_kernel(x_ref, w1_ref, w2_ref, wt1_ref, wt2_ref, bias_ref, out_ref):
    f32 = jnp.float32
    bf16 = jnp.bfloat16

    # Packed (8, 128) bias tile -> full-lane slices (no masked sub-lane loads).
    b1 = bias_ref[0:1, :]
    b2 = bias_ref[1:2, :]
    bt1 = bias_ref[2:3, :]
    bt2 = bias_ref[3:4, :]

    # x arrives as f32 (single HBM pass); cast to bf16 on the VPU under the DMA.
    x = x_ref[...].astype(bf16)

    # Fused bottom layer 1 (width-split folded into the weight), f32 MXU acc.
    h = jnp.dot(x, w1_ref[...], preferred_element_type=f32) + b1
    h = jnp.maximum(h, 0.0).astype(bf16)

    # Fused bottom layer 2 (block-diagonal): e = concat(e_a, e_b), no ReLU.
    e = (jnp.dot(h, w2_ref[...], preferred_element_type=f32) + b2).astype(bf16)

    # Top model: Linear -> ReLU -> Linear (128-lane-padded logits, bf16 out).
    ht = jnp.maximum(
        jnp.dot(e, wt1_ref[...], preferred_element_type=f32) + bt1, 0.0
    ).astype(bf16)
    out_ref[...] = (jnp.dot(ht, wt2_ref[...], preferred_element_type=f32)
                    + bt2).astype(out_ref.dtype)


def _linear_init(key, fan_in, fan_out):
    # PyTorch nn.Linear default: U(-1/sqrt(fan_in), 1/sqrt(fan_in))
    kw, kb = jax.random.split(key)
    bound = 1.0 / float(np.sqrt(fan_in))
    w = jax.random.uniform(kw, (fan_in, fan_out), jnp.float32, -bound, bound)
    b = jax.random.uniform(kb, (1, fan_out), jnp.float32, -bound, bound)
    return w, b


def make_vfl_params(key, in_dim, hidden=32, emb=16, top_hidden=32, num_classes=10):
    """Raw per-submodel parameters mirroring the PyTorch module structure."""
    keys = jax.random.split(key, 6)
    w1a, b1a = _linear_init(keys[0], in_dim, hidden)
    w2a, b2a = _linear_init(keys[1], hidden, emb)
    w1b, b1b = _linear_init(keys[2], in_dim, hidden)
    w2b, b2b = _linear_init(keys[3], hidden, emb)
    wt1, bt1 = _linear_init(keys[4], 2 * emb, top_hidden)
    wt2, bt2 = _linear_init(keys[5], top_hidden, num_classes)
    return dict(w1a=w1a, b1a=b1a, w2a=w2a, b2a=b2a,
                w1b=w1b, b1b=b1b, w2b=w2b, b2b=b2b,
                wt1=wt1, bt1=bt1, wt2=wt2, bt2=bt2)


def fuse_vfl_params(params, C, H, W, lane=LANE):
    """One-time packing of raw params into kernel-friendly fused bf16 arrays.

    Every layer's output width is zero-padded to 128 lanes so all matmuls,
    biases and intermediates are full-lane.  Padding is zeros everywhere, so
    the extra lanes stay exactly zero and do not change the result.
    """
    assert W % 2 == 0
    hidden = params["w1a"].shape[1]
    emb = params["w2a"].shape[1]
    top_hidden = params["wt1"].shape[1]
    num_classes = params["wt2"].shape[1]
    assert 2 * hidden <= lane and 2 * emb <= lane
    assert top_hidden <= lane and num_classes <= lane
    half = W // 2
    d_full = C * H * W

    idx = np.arange(d_full).reshape(C, H, W)
    idx_a = jnp.asarray(idx[:, :, :half].reshape(-1))
    idx_b = jnp.asarray(idx[:, :, half:].reshape(-1))

    # Layer 1: fold the width-split permutation into a single weight matrix.
    w1 = jnp.zeros((d_full, lane), jnp.float32)
    w1 = w1.at[idx_a, :hidden].set(params["w1a"])
    w1 = w1.at[idx_b, hidden:2 * hidden].set(params["w1b"])

    # Layer 2: block-diagonal so a single dot gives e = concat(e_a, e_b).
    w2 = jnp.zeros((lane, lane), jnp.float32)
    w2 = w2.at[:hidden, :emb].set(params["w2a"])
    w2 = w2.at[hidden:2 * hidden, emb:2 * emb].set(params["w2b"])

    # Top model weights, lane-padded.
    wt1 = jnp.zeros((lane, lane), jnp.float32)
    wt1 = wt1.at[:2 * emb, :top_hidden].set(params["wt1"])
    wt2 = jnp.zeros((lane, lane), jnp.float32)
    wt2 = wt2.at[:top_hidden, :num_classes].set(params["wt2"])

    # All biases packed into one (8, 128) f32 VMEM tile (pad lanes are zero).
    bias = jnp.zeros((8, lane), jnp.float32)
    bias = bias.at[0, :2 * hidden].set(
        jnp.concatenate([params["b1a"][0], params["b1b"][0]]))
    bias = bias.at[1, :2 * emb].set(
        jnp.concatenate([params["b2a"][0], params["b2b"][0]]))
    bias = bias.at[2, :top_hidden].set(params["bt1"][0])
    bias = bias.at[3, :num_classes].set(params["bt2"][0])

    return dict(w1=w1.astype(jnp.bfloat16), w2=w2.astype(jnp.bfloat16),
                wt1=wt1.astype(jnp.bfloat16), wt2=wt2.astype(jnp.bfloat16),
                bias=bias)


@functools.partial(jax.jit, static_argnames=("num_classes", "block_b"))
def vfl_forward(x, fused, num_classes=10, block_b=1024):
    """x: [B, C, H, W] float32 (NCHW). Returns logits [B, num_classes] bf16."""
    B = x.shape[0]
    w1, w2, wt1, wt2, bias = (fused["w1"], fused["w2"], fused["wt1"],
                              fused["wt2"], fused["bias"])
    d_full = w1.shape[0]
    out_pad = wt2.shape[1]

    # Contiguous (free) flatten; NO wrapper-side cast/pad passes over x.
    x_flat = x.reshape(B, d_full)

    # Batch tile: multiple of 8 sublanes, capped by block_b, and small enough
    # that the grid has >= 2 steps whenever B allows it (v7x 2-TC sharding).
    b8 = _round_up(B, 8)
    tb = min(block_b, max(8, _round_up(b8 // 2, 8)))
    grid = (pl.cdiv(B, tb),)   # ragged last block; OOB rows are masked on store

    flops = 2 * B * (d_full * w1.shape[1] + w2.size + wt1.size + wt2.size)
    bytes_accessed = (B * d_full * 4
                      + 2 * (w1.size + w2.size + wt1.size + wt2.size)
                      + 4 * bias.size
                      + B * out_pad * 2)

    out = pl.pallas_call(
        _vfl_forward_kernel,
        out_shape=jax.ShapeDtypeStruct((B, out_pad), jnp.bfloat16),
        grid=grid,
        in_specs=[
            pl.BlockSpec((tb, d_full), lambda i: (i, 0)),   # x: tiled, pipelined
            pl.BlockSpec(w1.shape, lambda i: (0, 0)),       # weights: VMEM-resident
            pl.BlockSpec(w2.shape, lambda i: (0, 0)),
            pl.BlockSpec(wt1.shape, lambda i: (0, 0)),
            pl.BlockSpec(wt2.shape, lambda i: (0, 0)),
            pl.BlockSpec(bias.shape, lambda i: (0, 0)),     # packed biases
        ],
        out_specs=pl.BlockSpec((tb, out_pad), lambda i: (i, 0)),
        compiler_params=pltpu.CompilerParams(
            dimension_semantics=("parallel",),   # shard batch grid across TCs (v7x)
            vmem_limit_bytes=48 * 1024 * 1024,   # fits v7x 64 MiB/TC with headroom
        ),
        cost_estimate=pl.CostEstimate(flops=flops, transcendentals=0,
                                      bytes_accessed=bytes_accessed),
    )(x_flat, w1, w2, wt1, wt2, bias)
    # Lane-dim slice only (no batch padding to strip); output is bf16.
    return out[:, :num_classes]


def _reference_forward(x, params, bf16_layer1):
    """Pure-JAX reference of VFLModel.forward (un-fused)."""
    B, C, H, W = x.shape
    x_a = x[:, :, :, : W // 2].reshape(B, -1)
    x_b = x[:, :, :, W // 2:].reshape(B, -1)
    w1a, w1b = params["w1a"], params["w1b"]
    if bf16_layer1:
        x_a = x_a.astype(jnp.bfloat16)
        x_b = x_b.astype(jnp.bfloat16)
        w1a = w1a.astype(jnp.bfloat16)
        w1b = w1b.astype(jnp.bfloat16)
    h_a = jnp.maximum(
        jnp.dot(x_a, w1a, preferred_element_type=jnp.float32) + params["b1a"], 0.0)
    e_a = h_a @ params["w2a"] + params["b2a"]
    h_b = jnp.maximum(
        jnp.dot(x_b, w1b, preferred_element_type=jnp.float32) + params["b1b"], 0.0)
    e_b = h_b @ params["w2b"] + params["b2b"]
    z = jnp.concatenate([e_a, e_b], axis=-1)
    h_t = jnp.maximum(z @ params["wt1"] + params["bt1"], 0.0)
    return h_t @ params["wt2"] + params["bt2"]


if __name__ == "__main__":
    key = jax.random.PRNGKey(0)
    k_x, k_p = jax.random.split(key)

    B, C, H, W = 2, 4, 16, 16
    num_classes = 10
    x = jax.random.normal(k_x, (B, C, H, W), jnp.float32)

    in_dim = C * H * (W // 2)
    params = make_vfl_params(k_p, in_dim, hidden=32, emb=16,
                             top_hidden=32, num_classes=num_classes)
    fused = fuse_vfl_params(params, C, H, W)

    out = vfl_forward(x, fused, num_classes=num_classes)
    out = jax.block_until_ready(out).astype(jnp.float32)

    ref_bf16 = _reference_forward(x, params, bf16_layer1=True)
    ref_f32 = _reference_forward(x, params, bf16_layer1=False)

    assert out.shape == (B, num_classes)
    assert jnp.allclose(out, ref_bf16, atol=2e-2, rtol=2e-2), \
        "mismatch vs bf16-matched JAX reference"
    assert jnp.allclose(out, ref_f32, atol=5e-2, rtol=5e-2), \
        "mismatch vs float32 JAX reference"

    print("KERNEL_OK")
</pallas_src>

<mosaic_0001>
module attributes {stable_mosaic.version = 11 : i64} {
  func.func @_vfl_forward_kernel(%arg0: i32, %arg1: memref<8x1024xf32, #tpu.memory_space<vmem>>, %arg2: memref<1024x128xbf16, #tpu.memory_space<vmem>>, %arg3: memref<128x128xbf16, #tpu.memory_space<vmem>>, %arg4: memref<128x128xbf16, #tpu.memory_space<vmem>>, %arg5: memref<128x128xbf16, #tpu.memory_space<vmem>>, %arg6: memref<8x128xf32, #tpu.memory_space<vmem>>, %arg7: memref<8x128xbf16, #tpu.memory_space<vmem>>) attributes {dimension_semantics = [#tpu.dimension_semantics<parallel>], iteration_bounds = array<i64: 1>, scalar_prefetch = 0 : i64, scratch_operands = 0 : i64, tpu.core_type = #tpu.core_type<tc>, window_params = [{transform_indices = @transform_0, window_bounds = array<i64: 8, 1024>}, {pipeline_mode = #tpu.pipeline_mode<synchronous>, transform_indices = @transform_1, window_bounds = array<i64: 1024, 128>}, {pipeline_mode = #tpu.pipeline_mode<synchronous>, transform_indices = @transform_2, window_bounds = array<i64: 128, 128>}, {pipeline_mode = #tpu.pipeline_mode<synchronous>, transform_indices = @transform_3, window_bounds = array<i64: 128, 128>}, {pipeline_mode = #tpu.pipeline_mode<synchronous>, transform_indices = @transform_4, window_bounds = array<i64: 128, 128>}, {pipeline_mode = #tpu.pipeline_mode<synchronous>, transform_indices = @transform_5, window_bounds = array<i64: 8, 128>}, {transform_indices = @transform_6, window_bounds = array<i64: 8, 128>}]} {
    %c0 = arith.constant 0 : index
    %c0_0 = arith.constant 0 : index
    %0 = vector.load %arg6[%c0, %c0_0] : memref<8x128xf32, #tpu.memory_space<vmem>>, vector<1x128xf32>
    %c1 = arith.constant 1 : index
    %c0_1 = arith.constant 0 : index
    %1 = vector.load %arg6[%c1, %c0_1] : memref<8x128xf32, #tpu.memory_space<vmem>>, vector<1x128xf32>
    %c2 = arith.constant 2 : index
    %c0_2 = arith.constant 0 : index
    %2 = vector.load %arg6[%c2, %c0_2] : memref<8x128xf32, #tpu.memory_space<vmem>>, vector<1x128xf32>
    %c3 = arith.constant 3 : index
    %c0_3 = arith.constant 0 : index
    %3 = vector.load %arg6[%c3, %c0_3] : memref<8x128xf32, #tpu.memory_space<vmem>>, vector<1x128xf32>
    %c0_4 = arith.constant 0 : index
    %c0_5 = arith.constant 0 : index
    %4 = vector.load %arg1[%c0_4, %c0_5] : memref<8x1024xf32, #tpu.memory_space<vmem>>, vector<8x1024xf32>
    %5 = arith.truncf %4 : vector<8x1024xf32> to vector<8x1024xbf16>
    %c0_6 = arith.constant 0 : index
    %c0_7 = arith.constant 0 : index
    %6 = vector.load %arg2[%c0_6, %c0_7] : memref<1024x128xbf16, #tpu.memory_space<vmem>>, vector<1024x128xbf16>
    %cst = arith.constant dense<0.000000e+00> : vector<8x128xf32>
    %7 = tpu.matmul %5, %6, %cst {dimension_numbers = #tpu.dot_dimension_numbers<[1], [0], [0], [1], [0, 0, 1, 1], [], []>} : vector<8x1024xbf16>, vector<1024x128xbf16>, vector<8x128xf32> -> vector<8x128xf32>
    %8 = vector.broadcast %0 : vector<1x128xf32> to vector<8x128xf32>
    %9 = arith.addf %7, %8 : vector<8x128xf32>
    %cst_8 = arith.constant 0.000000e+00 : f32
    %10 = vector.broadcast %cst_8 : f32 to vector<8x128xf32>
    %11 = arith.maximumf %9, %10 : vector<8x128xf32>
    %12 = arith.truncf %11 : vector<8x128xf32> to vector<8x128xbf16>
    %c0_9 = arith.constant 0 : index
    %c0_10 = arith.constant 0 : index
    %13 = vector.load %arg3[%c0_9, %c0_10] : memref<128x128xbf16, #tpu.memory_space<vmem>>, vector<128x128xbf16>
    %cst_11 = arith.constant dense<0.000000e+00> : vector<8x128xf32>
    %14 = tpu.matmul %12, %13, %cst_11 {dimension_numbers = #tpu.dot_dimension_numbers<[1], [0], [0], [1], [0, 0, 1, 1], [], []>} : vector<8x128xbf16>, vector<128x128xbf16>, vector<8x128xf32> -> vector<8x128xf32>
    %15 = vector.broadcast %1 : vector<1x128xf32> to vector<8x128xf32>
    %16 = arith.addf %14, %15 : vector<8x128xf32>
    %17 = arith.truncf %16 : vector<8x128xf32> to vector<8x128xbf16>
    %c0_12 = arith.constant 0 : index
    %c0_13 = arith.constant 0 : index
    %18 = vector.load %arg4[%c0_12, %c0_13] : memref<128x128xbf16, #tpu.memory_space<vmem>>, vector<128x128xbf16>
    %cst_14 = arith.constant dense<0.000000e+00> : vector<8x128xf32>
    %19 = tpu.matmul %17, %18, %cst_14 {dimension_numbers = #tpu.dot_dimension_numbers<[1], [0], [0], [1], [0, 0, 1, 1], [], []>} : vector<8x128xbf16>, vector<128x128xbf16>, vector<8x128xf32> -> vector<8x128xf32>
    %20 = vector.broadcast %2 : vector<1x128xf32> to vector<8x128xf32>
    %21 = arith.addf %19, %20 : vector<8x128xf32>
    %cst_15 = arith.constant 0.000000e+00 : f32
    %22 = vector.broadcast %cst_15 : f32 to vector<8x128xf32>
    %23 = arith.maximumf %21, %22 : vector<8x128xf32>
    %24 = arith.truncf %23 : vector<8x128xf32> to vector<8x128xbf16>
    %c0_16 = arith.constant 0 : index
    %c0_17 = arith.constant 0 : index
    %25 = vector.load %arg5[%c0_16, %c0_17] : memref<128x128xbf16, #tpu.memory_space<vmem>>, vector<128x128xbf16>
    %cst_18 = arith.constant dense<0.000000e+00> : vector<8x128xf32>
    %26 = tpu.matmul %24, %25, %cst_18 {dimension_numbers = #tpu.dot_dimension_numbers<[1], [0], [0], [1], [0, 0, 1, 1], [], []>} : vector<8x128xbf16>, vector<128x128xbf16>, vector<8x128xf32> -> vector<8x128xf32>
    %27 = vector.broadcast %3 : vector<1x128xf32> to vector<8x128xf32>
    %28 = arith.addf %26, %27 : vector<8x128xf32>
    %29 = arith.truncf %28 : vector<8x128xf32> to vector<8x128xbf16>
    %c0_19 = arith.constant 0 : index
    %c0_20 = arith.constant 0 : index
    %30 = vector.load %arg7[%c0_19, %c0_20] : memref<8x128xbf16, #tpu.memory_space<vmem>>, vector<8x128xbf16>
    tpu.vector_store %arg7[%c0_19, %c0_20], %29 {strides = array<i32>} : memref<8x128xbf16, #tpu.memory_space<vmem>>, vector<8x128xbf16>,
    return
  }
  func.func @transform_0(%arg0: i32) -> (i32, i32) {
    %c0_i32 = arith.constant 0 : i32
    %c0_i32_0 = arith.constant 0 : i32
    return %arg0, %c0_i32 : i32, i32
  }
  func.func @transform_1(%arg0: i32) -> (i32, i32) {
    %c0_i32 = arith.constant 0 : i32
    %c0_i32_0 = arith.constant 0 : i32
    %c0_i32_1 = arith.constant 0 : i32
    return %c0_i32, %c0_i32_0 : i32, i32
  }
  func.func @transform_2(%arg0: i32) -> (i32, i32) {
    %c0_i32 = arith.constant 0 : i32
    %c0_i32_0 = arith.constant 0 : i32
    %c0_i32_1 = arith.constant 0 : i32
    return %c0_i32, %c0_i32_0 : i32, i32
  }
  func.func @transform_3(%arg0: i32) -> (i32, i32) {
    %c0_i32 = arith.constant 0 : i32
    %c0_i32_0 = arith.constant 0 : i32
    %c0_i32_1 = arith.constant 0 : i32
    return %c0_i32, %c0_i32_0 : i32, i32
  }
  func.func @transform_4(%arg0: i32) -> (i32, i32) {
    %c0_i32 = arith.constant 0 : i32
    %c0_i32_0 = arith.constant 0 : i32
    %c0_i32_1 = arith.constant 0 : i32
    return %c0_i32, %c0_i32_0 : i32, i32
  }
  func.func @transform_5(%arg0: i32) -> (i32, i32) {
    %c0_i32 = arith.constant 0 : i32
    %c0_i32_0 = arith.constant 0 : i32
    %c0_i32_1 = arith.constant 0 : i32
    return %c0_i32, %c0_i32_0 : i32, i32
  }
  func.func @transform_6(%arg0: i32) -> (i32, i32) {
    %c0_i32 = arith.constant 0 : i32
    %c0_i32_0 = arith.constant 0 : i32
    return %arg0, %c0_i32 : i32, i32
  }
}

</mosaic_0001>

<bundles_post_ra>
// kernel: vfl_forward.1
= control target key start
LH: loop header
LB: loop body
LE: loop exit
PB: predicated region body
PF: predicated region fallthrough
CT: control target
= control target key end

     0   :  { %11 = vsyncpa [#allocation3], 0  ;;  %s1847_s0 = inlined_call_operand.vmem [shape: f32[2,1024], index: 0, kind: input, shape index: {}]   ;;  %s1848_s1 = inlined_call_operand.hbm [shape: bf16[1024,128], index: 1, kind: input, shape index: {}]   ;;  %s1849_s2 = inlined_call_operand.vmem [shape: bf16[128,128], index: 2, kind: input, shape index: {}]   ;;  %s1850_s3 = inlined_call_operand.vmem [shape: bf16[128,128], index: 3, kind: input, shape index: {}]   ;;  %s1851_s4 = inlined_call_operand.hbm [shape: bf16[128,128], index: 4, kind: input, shape index: {}]   ;;  %s1852_s5 = inlined_call_operand.vmem [shape: f32[8,128], index: 5, kind: input, shape index: {}]   ;;  %s1853_s6 = inlined_call_operand.hbm [shape: bf16[2,128], index: 6, kind: output, shape index: {}]  }
   0x1   :  { %12 = vsyncpa [#allocation6], 0 }
   0x2   :  { %13 = vsyncpa [#allocation4], 0  ;;  %s1664_s21 = smov [#allocation2]  }
   0x3   :  { %s21_s22 = sshll.u32 %s1664_s21, 4  ;;  %s22_s22 = int_to_ptr.vmem [resolvable:$true] %s21_s22 }
   0x4   :  { %s1606_s23 = scalar_lea.vmem %s22_s22, 8192  ;;  %p1611_p1 = scmp.lt.s32.totalorder %s22_s22, %s22_s22 }
   0x5   :  { %p1607_p0 = scmp.ne.s32.totalorder %s22_s22, %s1606_s23  ;;  %p1612_p2 = scmp.lt.s32.totalorder %s1606_s23, %s1606_s23 }
   0x7   :  { %p1613_p3 = por %p1612_p2, %p1611_p1 }
   0x9   :  { %p1614_p4 = pnand %p1613_p3, %p1607_p0 }
   0xb   :  { %1617 = shalt.err (!%p1614_p4)
}
   0xc   :  { %s1665_s24 = smov 64   ;;  %s1666_s25 = smov 4  }
   0xd   :  { %27 = dma.hbm_to_vmem [thread:$0]  %s1848_s1, 8192, %s22_s22, [#allocation3], %s1665_s24, %s1665_s24, %s1666_s25  }
   0xe   :  { %s1667_s28 = smov [#allocation5]  }
   0xf   :  { %s37_s29 = sshll.u32 %s1667_s28, 4  ;;  %s38_s29 = int_to_ptr.vmem [resolvable:$true] %s37_s29 }
  0x10   :  { %s1626_s30 = scalar_lea.vmem %s38_s29, 1024  ;;  %p1631_p6 = scmp.lt.s32.totalorder %s38_s29, %s38_s29 }
  0x11   :  { %p1627_p5 = scmp.ne.s32.totalorder %s38_s29, %s1626_s30  ;;  %p1632_p7 = scmp.lt.s32.totalorder %s1626_s30, %s1626_s30 }
  0x13   :  { %p1633_p8 = por %p1632_p7, %p1631_p6 }
  0x15   :  { %p1634_p9 = pnand %p1633_p8, %p1627_p5 }
  0x17   :  { %1637 = shalt.err (!%p1634_p9)
}
  0x18   :  { %43 = dma.hbm_to_vmem [thread:$0]  %s1851_s4, 1024, %s38_s29, [#allocation6], %s1665_s24, %s1665_s24, %s1666_s25  }
  0x19   :  { %1658 = dma.done.wait [#allocation3], 8192  }
  0x1a   :  { %1659 = vsyncadd [#allocation3], 4294959104 }
  0x1b   :  { %1660 = dma.done.wait [#allocation6], 1024  }
  0x1c   :  { %1661 = vsyncadd [#allocation6], 4294966272  ;;  %v1498_v0 = vld [vmem:[#allocation2 + $0x78] sm:$0xff]   ;;  %v1502_v4 = vld [vmem:[#allocation2 + $0x70] sm:$0xff]   ;;  %v1668_v24 = vmov 1983009808   ;;  %v80_v26 = vlaneseq }
  0x1d   :  { %v1499_v1 = vld [vmem:[#allocation2 + $0xf8] sm:$0xff]   ;;  %1312 = vmatprep.subr.bf16.mxu0 %v1498_v0  ;;  %v1503_v5 = vld [vmem:[#allocation2 + $0xf0] sm:$0xff]   ;;  %v1506_v8 = vld [vmem:[#allocation2 + $0x68] sm:$0xff]   ;;  %v78_v25 = vunpack.c.l.s4 %v1668_v24  ;;  %vm1670_vm0 = vmmov 0  }
  0x1e   :  { %v1500_v2 = vld [vmem:[#allocation2 + $0x38] sm:$0xff]   ;;  %1334 = vmatprep.subr.bf16.mxu1 %v1499_v1  ;;  %v1504_v6 = vld [vmem:[#allocation2 + $0x30] sm:$0xff]   ;;  %v1507_v9 = vld [vmem:[#allocation2 + $0xe8] sm:$0xff]   ;;  %v1716_v32 = vshrl.u32 %v80_v26, 7 }
  0x1f   :  { %v1501_v3 = vld [vmem:[#allocation2 + $0xb8] sm:$0xff]   ;;  %1313 = vmatpush3.bf16.msra.mxu0 %v1500_v2  ;;  %v1505_v7 = vld [vmem:[#allocation2 + $0xb0] sm:$0xff]   ;;  %v1508_v10 = vld [vmem:[#allocation2 + $0x28] sm:$0xff]   ;;  %v79_v31 = vunpack.c.0.s8 %v78_v25 }
  0x20   :  { %1335 = vmatpush3.bf16.msra.mxu1 %v1501_v3  ;;  %1314 = vmatprep.subr.bf16.mxu0 %v1502_v4  ;;  %v1509_v11 = vld [vmem:[#allocation2 + $0xa8] sm:$0xff]   ;;  %v1510_v12 = vld [vmem:[#allocation2 + $0x60] sm:$0xff]   ;;  %v1514_v16 = vld [vmem:[#allocation2 + $0x58] sm:$0xff]  }
  0x21   :  { %1336 = vmatprep.subr.bf16.mxu1 %v1503_v5  ;;  %v1511_v13 = vld [vmem:[#allocation2 + $0xe0] sm:$0xff]   ;;  %v1515_v17 = vld [vmem:[#allocation2 + $0xd8] sm:$0xff]   ;;  %v1518_v20 = vld [vmem:[#allocation2 + $0x50] sm:$0xff]   ;;  %v1719_v37 = vsub.s32 %v79_v31, %v1716_v32 }
  0x22   :  { %v1512_v14 = vld [vmem:[#allocation2 + $0x20] sm:$0xff]   ;;  %v1516_v18 = vld [vmem:[#allocation2 + $0x18] sm:$0xff]   ;;  %v1519_v21 = vld [vmem:[#allocation2 + $0xd0] sm:$0xff]  }
  0x23   :  { %1315 = vmatpush3.bf16.msra.mxu0 %v1504_v6  ;;  %v1513_v15 = vld [vmem:[#allocation2 + $0xa0] sm:$0xff]   ;;  %v1517_v19 = vld [vmem:[#allocation2 + $0x98] sm:$0xff]   ;;  %v1520_v22 = vld [vmem:[#allocation2 + $0x10] sm:$0xff]  }
  0x24   :  { %1337 = vmatpush3.bf16.msra.mxu1 %v1505_v7  ;;  %1316 = vmatprep.subr.bf16.mxu0 %v1506_v8  ;;  %v1521_v23 = vld [vmem:[#allocation2 + $0x90] sm:$0xff]   ;;  %v1522_v27 = vld [vmem:[#allocation2 + $0x48] sm:$0xff]   ;;  %v1526_v33 = vld [vmem:[#allocation2 + $0x40] sm:$0xff]  }
  0x25   :  { %1338 = vmatprep.subr.bf16.mxu1 %v1507_v9  ;;  %v1523_v28 = vld [vmem:[#allocation2 + $0xc8] sm:$0xff]   ;;  %v1527_v34 = vld [vmem:[#allocation2 + $0xc0] sm:$0xff]   ;;  %v1536_v44 = vld [vmem:[#allocation2 + $0x178] sm:$0xff]  }
  0x26   :  { %v1524_v29 = vld [vmem:[#allocation2 + $0x8] sm:$0xff]   ;;  %v1528_v35 = vld [vmem:[#allocation2] sm:$0xff]   ;;  %v1537_v47 = vld [vmem:[#allocation2 + $0x1f8] sm:$0xff]  }
  0x27   :  { %1317 = vmatpush3.bf16.msra.mxu0 %v1508_v10  ;;  %v1525_v30 = vld [vmem:[#allocation2 + $0x88] sm:$0xff]   ;;  %v1529_v36 = vld [vmem:[#allocation2 + $0x80] sm:$0xff]   ;;  %v1538_v50 = vld [vmem:[#allocation2 + $0x138] sm:$0xff]  }
  0x28   :  { %1339 = vmatpush3.bf16.msra.mxu1 %v1509_v11  ;;  %1318 = vmatprep.subr.bf16.mxu0 %v1510_v12  ;;  %v1530_v38 = vld [vmem:[%s1847_s0] ss:$16 sps:$4 sm:$0xff]   ;;  %v1534_v40 = vld [vmem:[%s1847_s0 + $0x4] ss:$16 sps:$4 sm:$0xff]   ;;  %v1539_v53 = vld [vmem:[#allocation2 + $0x1b8] sm:$0xff]  }
  0x29   :  { %1340 = vmatprep.subr.bf16.mxu1 %v1511_v13  ;;  %v1532_v39 = vld [vmem:[%s1847_s0 + $0x20] ss:$16 sps:$4 sm:$0xff]   ;;  %v1535_v41 = vld [vmem:[%s1847_s0 + $0x24] ss:$16 sps:$4 sm:$0xff]   ;;  %v83_v42 = vrot.slane %v1530_v38, %v1719_v37  ;;  %v90_v45 = vrot.slane %v1534_v40, %v1719_v37  ;;  %v1544_v62 = vld [vmem:[#allocation2 + $0x168] sm:$0xff]  }
  0x2a   :  { %v97_v43 = vrot.slane %v1532_v39, %v1719_v37  ;;  %v104_v46 = vrot.slane %v1535_v41, %v1719_v37  ;;  %v1540_v56 = vld [vmem:[#allocation2 + $0x170] sm:$0xff]   ;;  %v1545_v63 = vld [vmem:[#allocation2 + $0x1e8] sm:$0xff]   ;;  %v1548_v2 = vld [vmem:[#allocation2 + $0x160] sm:$0xff]   ;;  %v1669_v41 = vmov 0.0  }
  0x2b   :  { %1319 = vmatpush3.bf16.msra.mxu0 %v1512_v14  ;;  %v1541_v59 = vld [vmem:[#allocation2 + $0x1f0] sm:$0xff]   ;;  %v1546_v0 = vld [vmem:[#allocation2 + $0x128] sm:$0xff]   ;;  %v1549_v3 = vld [vmem:[#allocation2 + $0x1e0] sm:$0xff]  }
  0x2c   :  { %1341 = vmatpush3.bf16.msra.mxu1 %v1513_v15  ;;  %1320 = vmatprep.subr.bf16.mxu0 %v1514_v16  ;;  %v106_v48 = vcombine.high %v83_v42, %v97_v43  ;;  %v105_v49 = vcombine.low %v83_v42, %v97_v43  ;;  %v108_v51 = vcombine.high %v90_v45, %v104_v46  ;;  %v1542_v60 = vld [vmem:[#allocation2 + $0x130] sm:$0xff]   ;;  %v1547_v1 = vld [vmem:[#allocation2 + $0x1a8] sm:$0xff]   ;;  %v1550_v4 = vld [vmem:[#allocation2 + $0x120] sm:$0xff]  }
  0x2d   :  { %1342 = vmatprep.subr.bf16.mxu1 %v1515_v17  ;;  %v107_v52 = vcombine.low %v90_v45, %v104_v46  ;;  %v1543_v61 = vld [vmem:[#allocation2 + $0x1b0] sm:$0xff]   ;;  %v1551_v5 = vld [vmem:[#allocation2 + $0x1a0] sm:$0xff]   ;;  %v1552_v6 = vld [vmem:[#allocation2 + $0x158] sm:$0xff]  }
  0x2e   :  { %v154_v54 = vpack.c.bf16 %v106_v48, %v106_v48  ;;  %v153_v55 = vpack.c.bf16 %v105_v49, %v105_v49  ;;  %v156_v57 = vpack.c.bf16 %v108_v51, %v108_v51  ;;  %v1553_v7 = vld [vmem:[#allocation2 + $0x1d8] sm:$0xff]   ;;  %v1556_v10 = vld [vmem:[#allocation2 + $0x150] sm:$0xff]   ;;  %v1560_v14 = vld [vmem:[#allocation2 + $0x148] sm:$0xff]  }
  0x2f   :  { %1321 = vmatpush3.bf16.msra.mxu0 %v1516_v18  ;;  %v155_v58 = vpack.c.bf16 %v107_v52, %v107_v52  ;;  %v1554_v8 = vld [vmem:[#allocation2 + $0x118] sm:$0xff]   ;;  %v1557_v11 = vld [vmem:[#allocation2 + $0x1d0] sm:$0xff]   ;;  %v1561_v15 = vld [vmem:[#allocation2 + $0x1c8] sm:$0xff]  }
  0x30   :  { %1343 = vmatpush3.bf16.msra.mxu1 %v1517_v19  ;;  %1322 = vmatprep.subr.bf16.mxu0 %v1518_v20  ;;  %v1555_v9 = vld [vmem:[#allocation2 + $0x198] sm:$0xff]   ;;  %v1558_v12 = vld [vmem:[#allocation2 + $0x110] sm:$0xff]   ;;  %v1562_v16 = vld [vmem:[#allocation2 + $0x108] sm:$0xff]  }
  0x31   :  { %1344 = vmatprep.subr.bf16.mxu1 %v1519_v21  ;;  %709 = vmatprep.mubr.bf16.mxu0 %v154_v54  ;;  %v1559_v13 = vld [vmem:[#allocation2 + $0x190] sm:$0xff]   ;;  %v1563_v17 = vld [vmem:[#allocation2 + $0x188] sm:$0xff]   ;;  %v1564_v18 = vld [vmem:[#allocation2 + $0x140] sm:$0xff]  }
  0x32   :  { %749 = vmatprep.mubr.bf16.mxu1 %v156_v57  ;;  %v1565_v19 = vld [vmem:[#allocation2 + $0x1c0] sm:$0xff]   ;;  %v1572_v24 = vld [vmem:[%s1847_s0 + $0xc] ss:$16 sps:$4 sm:$0xff]   ;;  %v1579_v45 = vld [vmem:[%s1849_s2 + $0x10] sm:$0xff]  }
  0x33   :  { %1323 = vmatpush3.bf16.msra.mxu0 %v1520_v22  ;;  %v1566_v20 = vld [vmem:[#allocation2 + $0x100] sm:$0xff]   ;;  %v1568_v22 = vld [vmem:[%s1847_s0 + $0x8] ss:$16 sps:$4 sm:$0xff]   ;;  %v1573_v25 = vld [vmem:[%s1847_s0 + $0x2c] ss:$16 sps:$4 sm:$0xff]  }
  0x34   :  { %1345 = vmatpush3.bf16.msra.mxu1 %v1521_v23  ;;  %1324 = vmatprep.subr.bf16.mxu0 %v1522_v27  ;;  %v1567_v21 = vld [vmem:[#allocation2 + $0x180] sm:$0xff]   ;;  %v1570_v23 = vld [vmem:[%s1847_s0 + $0x28] ss:$16 sps:$4 sm:$0xff]   ;;  %v119_v26 = vrot.slane %v1568_v22, %v1719_v37  ;;  %v1583_v49 = vld [vmem:[%s1850_s3 + $0x30] sm:$0xff]  }
  0x35   :  { %1346 = vmatprep.subr.bf16.mxu1 %v1523_v28  ;;  %v133_v27 = vrot.slane %v1570_v23, %v1719_v37  ;;  %v126_v28 = vrot.slane %v1572_v24, %v1719_v37  ;;  %v1574_v40 = vld [vmem:[%s1849_s2 + $0x38] sm:$0xff]   ;;  %v1576_v42 = vld [vmem:[%s1849_s2 + $0x28] sm:$0xff]   ;;  %v1577_v43 = vld [vmem:[%s1849_s2 + $0x20] sm:$0xff]  }
  0x36   :  { %v1580_v46 = vld [vmem:[%s1849_s2 + $0x8] sm:$0xff]   ;;  %v1582_v48 = vld [vmem:[%s1850_s3 + $0x38] sm:$0xff]   ;;  %v1585_v51 = vld [vmem:[%s1850_s3 + $0x20] sm:$0xff]  }
  0x37   :  { %1325 = vmatpush3.bf16.msra.mxu0 %v1524_v29  ;;  %v140_v29 = vrot.slane %v1573_v25, %v1719_v37  ;;  %v141_v31 = vcombine.low %v119_v26, %v133_v27  ;;  %v1575_v37 = vld [vmem:[%s1849_s2 + $0x30] sm:$0xff]   ;;  %v1586_v52 = vld [vmem:[%s1850_s3 + $0x18] sm:$0xff]   ;;  %v1588_v54 = vld [vmem:[%s1850_s3 + $0x8] sm:$0xff]  }
  0x38   :  { %1347 = vmatpush3.bf16.msra.mxu1 %v1525_v30  ;;  %1326 = vmatprep.subr.bf16.mxu0 %v1526_v33  ;;  %v142_v30 = vcombine.high %v119_v26, %v133_v27  ;;  %v1593_v22 = vld [vmem:[#allocation5 + $0x20] sm:$0xff]   ;;  %v1594_v23 = vld [vmem:[#allocation5 + $0x18] sm:$0xff]   ;;  %v1595_v24 = vld [vmem:[#allocation5 + $0x10] sm:$0xff]  }
  0x39   :  { %1348 = vmatprep.subr.bf16.mxu1 %v1527_v34  ;;  %v144_v33 = vcombine.high %v126_v28, %v140_v29  ;;  %v143_v34 = vcombine.low %v126_v28, %v140_v29  ;;  %v1283_v25 = vld [vmem:[%s1852_s5 + $0x1] ss:$0 sm:$0xff] }
  0x3b   :  { %1327 = vmatpush3.bf16.msra.mxu0 %v1528_v35  ;;  %v158_v35 = vpack.c.bf16 %v142_v30, %v142_v30  ;;  %v160_v38 = vpack.c.bf16 %v144_v33, %v144_v33  ;;  %v159_v39 = vpack.c.bf16 %v143_v34, %v143_v34  ;;  %v1596_v33 = vld [vmem:[#allocation5 + $0x8] sm:$0xff]   ;;  %v1597_v34 = vld [vmem:[#allocation5] sm:$0xff]  }
  0x3c   :  { %1349 = vmatpush3.bf16.msra.mxu1 %v1529_v36  ;;  %1356 = vmatprep.subr.bf16.mxu0 %v1536_v44  ;;  %v157_v36 = vpack.c.bf16 %v141_v31, %v141_v31  ;;  %v1578_v44 = vld [vmem:[%s1849_s2 + $0x18] sm:$0xff]  }
  0x3d   :  { %1378 = vmatprep.subr.bf16.mxu1 %v1537_v47  ;;  %v1581_v47 = vld [vmem:[%s1849_s2] sm:$0xff]  }
  0x3e   :  { %710 = vmatmul.mubr.bf16.vlgmr.msra.gmra.mxu0 %v153_v55 }
  0x3f   :  { %750 = vmatmul.mubr.bf16.vlgmr.msra.gmra.mxu1 %v155_v58  ;;  %1357 = vmatpush3.bf16.msra.mxu0 %v1538_v50  ;;  %v1584_v50 = vld [vmem:[%s1850_s3 + $0x28] sm:$0xff]  }
  0x40   :  { %1379 = vmatpush3.bf16.msra.mxu1 %v1539_v53  ;;  %1358 = vmatprep.subr.bf16.mxu0 %v1540_v56  ;;  %v1587_v53 = vld [vmem:[%s1850_s3 + $0x10] sm:$0xff]  }
  0x41   :  { %1380 = vmatprep.subr.bf16.mxu1 %v1541_v59  ;;  %789 = vmatprep.mubr.bf16.mxu0 %v158_v35  ;;  %v1292_v35 = vld [vmem:[%s1852_s5 + $0x2] ss:$0 sm:$0xff] }
  0x42   :  { %829 = vmatprep.mubr.bf16.mxu1 %v160_v38 }
  0x43   :  { %1359 = vmatpush3.bf16.msra.mxu0 %v1542_v60 }
  0x44   :  { %1381 = vmatpush3.bf16.msra.mxu1 %v1543_v61  ;;  %1360 = vmatprep.subr.bf16.mxu0 %v1544_v62 }
  0x45   :  { %1382 = vmatprep.subr.bf16.mxu1 %v1545_v63 }
  0x47   :  { %1361 = vmatpush3.bf16.msra.mxu0 %v1546_v0  ;;  %v1218_v0 = vld [vmem:[%s1852_s5] ss:$0 sm:$0xff] }
  0x48   :  { %1383 = vmatpush3.bf16.msra.mxu1 %v1547_v1  ;;  %1362 = vmatprep.subr.bf16.mxu0 %v1548_v2 }
  0x49   :  { %1384 = vmatprep.subr.bf16.mxu1 %v1549_v3 }
  0x4b   :  { %1363 = vmatpush3.bf16.msra.mxu0 %v1550_v4 }
  0x4c   :  { %1385 = vmatpush3.bf16.msra.mxu1 %v1551_v5  ;;  %1364 = vmatprep.subr.bf16.mxu0 %v1552_v6 }
  0x4d   :  { %1386 = vmatprep.subr.bf16.mxu1 %v1553_v7 }
  0x4f   :  { %1365 = vmatpush3.bf16.msra.mxu0 %v1554_v8 }
  0x50   :  { %1387 = vmatpush3.bf16.msra.mxu1 %v1555_v9  ;;  %1366 = vmatprep.subr.bf16.mxu0 %v1556_v10 }
  0x51   :  { %1388 = vmatprep.subr.bf16.mxu1 %v1557_v11 }
  0x53   :  { %1367 = vmatpush3.bf16.msra.mxu0 %v1558_v12 }
  0x54   :  { %1389 = vmatpush3.bf16.msra.mxu1 %v1559_v13  ;;  %1368 = vmatprep.subr.bf16.mxu0 %v1560_v14 }
  0x55   :  { %1390 = vmatprep.subr.bf16.mxu1 %v1561_v15 }
  0x57   :  { %1369 = vmatpush3.bf16.msra.mxu0 %v1562_v16 }
  0x58   :  { %1391 = vmatpush3.bf16.msra.mxu1 %v1563_v17  ;;  %1370 = vmatprep.subr.bf16.mxu0 %v1564_v18  ;;  %v1589_v18 = vld [vmem:[%s1850_s3] sm:$0xff]  }
  0x59   :  { %1392 = vmatprep.subr.bf16.mxu1 %v1565_v19  ;;  %v1590_v19 = vld [vmem:[#allocation5 + $0x38] sm:$0xff]  }
  0x5b   :  { %1371 = vmatpush3.bf16.msra.mxu0 %v1566_v20  ;;  %v1591_v20 = vld [vmem:[#allocation5 + $0x30] sm:$0xff]  }
  0x5c   :  { %1393 = vmatpush3.bf16.msra.mxu1 %v1567_v21  ;;  %1427 = vmatprep.subr.bf16.mxu0 %v1669_v41  ;;  %v1592_v21 = vld [vmem:[#allocation5 + $0x28] sm:$0xff]  }
  0x5d   :  { %1447 = vmatprep.subr.bf16.mxu1 %v1669_v41 }
  0x5e   :  { %790 = vmatmul.mubr.bf16.vlgmr.msra.gmra.mxu0 %v157_v36 }
  0x5f   :  { %830 = vmatmul.mubr.bf16.vlgmr.msra.gmra.mxu1 %v159_v39  ;;  %1428 = vmatpush3.bf16.msra.mxu0 %v1574_v40 }
  0x60   :  { %1429 = vmatprep.subr.bf16.mxu0 %v1669_v41  ;;  %1443 = vmatprep.mubr.msk.bf16.mxu0 %vm1670_vm0, %v1669_v41 }
  0x61   :  { %1463 = vmatprep.mubr.msk.bf16.mxu1 %vm1670_vm0, %v1669_v41  ;;  %1448 = vmatpush3.bf16.msra.mxu1 %v1582_v48 }
  0x62   :  { %1449 = vmatprep.subr.bf16.mxu1 %v1669_v41 }
  0x63   :  { %1430 = vmatpush3.bf16.msra.mxu0 %v1575_v37 }
  0x64   :  { %1431 = vmatprep.subr.bf16.mxu0 %v1669_v41 }
  0x65   :  { %1450 = vmatpush3.bf16.msra.mxu1 %v1583_v49 }
  0x66   :  { %1451 = vmatprep.subr.bf16.mxu1 %v1669_v41 }
  0x67   :  { %1432 = vmatpush3.bf16.msra.mxu0 %v1576_v42 }
  0x68   :  { %1433 = vmatprep.subr.bf16.mxu0 %v1669_v41 }
  0x69   :  { %1452 = vmatpush3.bf16.msra.mxu1 %v1584_v50 }
  0x6a   :  { %1453 = vmatprep.subr.bf16.mxu1 %v1669_v41 }
  0x6b   :  { %1434 = vmatpush3.bf16.msra.mxu0 %v1577_v43 }
  0x6c   :  { %1435 = vmatprep.subr.bf16.mxu0 %v1669_v41 }
  0x6d   :  { %1454 = vmatpush3.bf16.msra.mxu1 %v1585_v51 }
  0x6e   :  { %1455 = vmatprep.subr.bf16.mxu1 %v1669_v41 }
  0x6f   :  { %1436 = vmatpush3.bf16.msra.mxu0 %v1578_v44  ;;  %v1671_v44 = vmov 1966171168  }
  0x70   :  { %1437 = vmatprep.subr.bf16.mxu0 %v1669_v41 }
  0x71   :  { %1456 = vmatpush3.bf16.msra.mxu1 %v1586_v52 }
  0x72   :  { %1457 = vmatprep.subr.bf16.mxu1 %v1669_v41 }
  0x73   :  { %1438 = vmatpush3.bf16.msra.mxu0 %v1579_v45  ;;  %v1169_v45 = vunpack.c.l.s4 %v1671_v44 }
  0x74   :  { %1439 = vmatprep.subr.bf16.mxu0 %v1669_v41 }
  0x75   :  { %1458 = vmatpush3.bf16.msra.mxu1 %v1587_v53 }
  0x76   :  { %1459 = vmatprep.subr.bf16.mxu1 %v1669_v41 }
  0x77   :  { %1440 = vmatpush3.bf16.msra.mxu0 %v1580_v46  ;;  %v1170_v46 = vunpack.c.0.s8 %v1169_v45 }
  0x78   :  { %1441 = vmatprep.subr.bf16.mxu0 %v1669_v41 }
  0x79   :  { %1460 = vmatpush3.bf16.msra.mxu1 %v1588_v54  ;;  %v1173_v49 = vsub.s32 %v1170_v46, %v1716_v32 }
  0x7a   :  { %1461 = vmatprep.subr.bf16.mxu1 %v1669_v41 }
  0x7b   :  { %1442 = vmatpush3.bf16.msra.mxu0 %v1581_v47 }
  0x7c   :  { %1467 = vmatprep.subr.bf16.mxu0 %v1669_v41 }
  0x7d   :  { %1462 = vmatpush3.bf16.msra.mxu1 %v1589_v18 }
  0xfe   :  { %v1328_v55 = vpop.f32.mrf.mxu0 }
  0xff   :  { %v1350_v56 = vpop.f32.mrf.mxu1 }
 0x100   :  { %v1329_v57 = vpop.f32.mrf.mxu0 }
 0x101   :  { %v1351_v58 = vpop.f32.mrf.mxu1  ;;  %v1330_v63 = vadd.f32 %v1329_v57, %v1328_v55 }
 0x102   :  { %v1331_v59 = vpop.f32.mrf.mxu0  ;;  %v1352_v2 = vadd.f32 %v1351_v58, %v1350_v56 }
 0x103   :  { %v1353_v60 = vpop.f32.mrf.mxu1  ;;  %v712_v1 = vadd.f32 %v1330_v63, %v1218_v0 }
 0x104   :  { %v1332_v61 = vpop.f32.mrf.mxu0 }
 0x105   :  { %v1354_v62 = vpop.f32.mrf.mxu1  ;;  %v752_v6 = vadd.f32 %v1352_v2, %v712_v1 }
 0x11e   :  { %v1372_v3 = vpop.f32.mrf.mxu0 }
 0x11f   :  { %v1394_v4 = vpop.f32.mrf.mxu1 }
 0x120   :  { %v1373_v5 = vpop.f32.mrf.mxu0 }
 0x121   :  { %v1374_v7 = vadd.f32 %v1373_v5, %v1372_v3  ;;  %v1395_v8 = vpop.f32.mrf.mxu1 }
 0x122   :  { %v1375_v9 = vpop.f32.mrf.mxu0  ;;  %v1396_v11 = vadd.f32 %v1395_v8, %v1394_v4 }
 0x123   :  { %v792_v10 = vadd.f32 %v1374_v7, %v752_v6  ;;  %v1397_v12 = vpop.f32.mrf.mxu1 }
 0x124   :  { %v1376_v13 = vpop.f32.mrf.mxu0 }
 0x125   :  { %v832_v14 = vadd.f32 %v1396_v11, %v792_v10  ;;  %v1398_v15 = vpop.f32.mrf.mxu1 }
 0x127   :  { %v837_v16 = vmax.f32 %v832_v14, 0.0 }
 0x129   :  { %v838_v17 = vpack.c.bf16 %v837_v16, %v837_v16 }
 0x12b   :  { %1444 = vmatmul.mubr.bf16.vlgmr.msra.gmra.mxu0 %v838_v17 }
 0x12c   :  { %1483 = vmatprep.mubr.msk.bf16.mxu0 %vm1670_vm0, %v1669_v41  ;;  %1468 = vmatpush3.bf16.msra.mxu0 %v1590_v19 }
 0x12d   :  { %1469 = vmatprep.subr.bf16.mxu0 %v1669_v41 }
 0x130   :  { %1470 = vmatpush3.bf16.msra.mxu0 %v1591_v20 }
 0x131   :  { %1471 = vmatprep.subr.bf16.mxu0 %v1669_v41 }
 0x134   :  { %1472 = vmatpush3.bf16.msra.mxu0 %v1592_v21 }
 0x135   :  { %1473 = vmatprep.subr.bf16.mxu0 %v1669_v41 }
 0x138   :  { %1474 = vmatpush3.bf16.msra.mxu0 %v1593_v22 }
 0x139   :  { %1475 = vmatprep.subr.bf16.mxu0 %v1669_v41 }
 0x13c   :  { %1476 = vmatpush3.bf16.msra.mxu0 %v1594_v23 }
 0x13d   :  { %1477 = vmatprep.subr.bf16.mxu0 %v1669_v41 }
 0x140   :  { %1478 = vmatpush3.bf16.msra.mxu0 %v1595_v24 }
 0x141   :  { %1479 = vmatprep.subr.bf16.mxu0 %v1669_v41 }
 0x144   :  { %1480 = vmatpush3.bf16.msra.mxu0 %v1596_v33 }
 0x145   :  { %1481 = vmatprep.subr.bf16.mxu0 %v1669_v41  ;;  %v1301_v41 = vld [vmem:[%s1852_s5 + $0x3] ss:$0 sm:$0xff] }
 0x148   :  { %1482 = vmatpush3.bf16.msra.mxu0 %v1597_v34 }
 0x1eb   :  { %v941_v26 = vpop.f32.mrf.mxu0 }
 0x1ec   :  { %v942_v27 = vadd.f32 %v1283_v25, %v941_v26 }
 0x1ed   :  { %v1445_v28 = vpop.f32.mrf.mxu0 }
 0x1ee   :  { %v947_v29 = vpack.c.bf16 %v942_v27, %v942_v27 }
 0x1ef   :  { %v944_v30 = vpop.f32.mrf.mxu0 }
 0x1f0   :  { %1464 = vmatmul.mubr.bf16.vlgmr.msra.gmra.mxu1 %v947_v29 }
 0x1f1   :  { %v1446_v31 = vpop.f32.mrf.mxu0 }
 0x2b0   :  { %v1050_v36 = vpop.f32.mrf.mxu1 }
 0x2b1   :  { %v1051_v38 = vadd.f32 %v1292_v35, %v1050_v36 }
 0x2b2   :  { %v1465_v39 = vpop.f32.mrf.mxu1 }
 0x2b3   :  { %v1056_v40 = vmax.f32 %v1051_v38, 0.0 }
 0x2b4   :  { %v1053_v37 = vpop.f32.mrf.mxu1 }
 0x2b5   :  { %v1057_v42 = vpack.c.bf16 %v1056_v40, %v1056_v40 }
 0x2b6   :  { %v1466_v43 = vpop.f32.mrf.mxu1 }
 0x2b7   :  { %1484 = vmatmul.mubr.bf16.vlgmr.msra.gmra.mxu0 %v1057_v42 }
 0x377   :  { %v1160_v47 = vpop.f32.mrf.mxu0 }
 0x378   :  { %v1161_v48 = vadd.f32 %v1301_v41, %v1160_v47 }
 0x379   :  { %v1485_v50 = vpop.f32.mrf.mxu0 }
 0x37a   :  { %v1166_v51 = vpack.c.bf16 %v1161_v48, %v1161_v48 }
 0x37b   :  { %v1163_v52 = vpop.f32.mrf.mxu0 }
 0x37c   :  { %v1174_v53 = vrot.slane %v1166_v51, %v1173_v49 }
 0x37d   :  { %v1486_v54 = vpop.f32.mrf.mxu0 }
 0x37e   :  { %v1175_v55 = vcombine.high %v1174_v53, %v1174_v53  ;;  %v1182_v56 = vrot.slane %v1174_v53, %v1173_v49  ;;  %1310 = vst.sshfl [vmem:[#allocation7] sm:$0x1 pattern:$0x73625140] %v1174_v53 }
 0x380   :  { %v1189_v57 = vrot.slane %v1175_v55, %v1173_v49  ;;  %v1190_v58 = vcombine.high %v1182_v56, %v1182_v56  ;;  %1311 = vst.sshfl [vmem:[#allocation7 + $0x1] sm:$0x1 pattern:$0x73625140] %v1175_v55 }
 0x382   :  { %v1191_v59 = vcombine.high %v1189_v57, %v1189_v57  ;;  %1198 = vst [vmem:[#allocation7 + $0x2] sm:$0x1] %v1190_v58 }
 0x384   :  { %1199 = vst [vmem:[#allocation7 + $0x3] sm:$0x1] %v1191_v59 }
 0x385   :  { %1204 = vsyncadd [#allocation4], 48  ;;  %s1672_s5 = smov [#allocation7]  }
 0x386   :  { %s1205_s1 = sshll.u32 %s1672_s5, 4  ;;  %s1206_s1 = int_to_ptr.vmem [resolvable:$true] %s1205_s1 }
 0x387   :  { %s1638_s4 = scalar_lea.vmem %s1206_s1, 16  ;;  %s1642_s9 = scalar_lea.vmem %s1206_s1, 64 }
 0x388   :  { %p1639_p10 = scmp.ne.s32.totalorder %s1206_s1, %s1638_s4  ;;  %p1643_p11 = scmp.lt.s32.totalorder %s1206_s1, %s1206_s1 }
 0x389   :  { %p1644_p12 = scmp.lt.s32.totalorder %s1642_s9, %s1638_s4 }
 0x38b   :  { %p1645_p13 = por %p1644_p12, %p1643_p11 }
 0x38d   :  { %p1646_p0 = pnand %p1645_p13, %p1639_p10 }
 0x38f   :  { %1649 = shalt.err (!%p1646_p0)
}
 0x390   :  { %s1673_s10 = smov 16   ;;  %s1674_s11 = smov 1  }
 0x391   :  { %1211 = dma.vmem_to_hbm [thread:$0]  %s1206_s1, 16, %s1853_s6, [#allocation4], %s1673_s10, %s1673_s10, %s1674_s11  }
 0x392   :  { %1662 = dma.done.wait [#allocation4], 64  }
 0x393   :  { %1663 = vsyncadd [#allocation4], 4294967232 }
 0x394   :  { %1215 = vsyncpa [#allocation3], 1 }
 0x395   :  { %1216 = vsyncpa [#allocation6], 1 }
 0x396   :  { %1217 = vsyncpa [#allocation4], 1 }

</bundles_post_ra>
